<compile_context>
chip_gen: v5e
topology: v5e:2x2
jax: 0.10.0
libtpu: 0.0.40
codegen_flags: <defaults>
</compile_context>

<pallas_src>
import math
from functools import partial

import jax
import jax.numpy as jnp
from jax.experimental import pallas as pl
from jax.experimental.pallas import tpu as pltpu

LN_EPS = 1e-5
NEG_INF = -1e10


# ----------------------------------------------------------------------------
# Pallas kernel: full encoder stack, one (batch_tile, layer) step per grid point
# ----------------------------------------------------------------------------
def _make_encoder_kernel(n_heads, head_dim, hidden, mb):
    def kernel(x_ref, bias_ref,
               wq, bq, wk, bk, wv, bv, wo, bo,
               ln1g, ln1b, w1, b1, w2, b2, ln2g, ln2b,
               o_ref, xacc):
        layer = pl.program_id(1)

        # Load the combined embeddings into the resident activation on layer 0.
        @pl.when(layer == 0)
        def _():
            xacc[...] = x_ref[...]

        xf = xacc[...]                                     # (Mb, H) f32 residual stream
        x16 = xf.astype(jnp.bfloat16)
        xh = jnp.broadcast_to(x16[None], (n_heads, mb, hidden))   # (nh, Mb, H) bf16

        def bdot(a, b):
            # batched over the leading (head) dim, contract a[2] with b[1], f32 acc
            return jax.lax.dot_general(
                a, b,
                dimension_numbers=(((2,), (1,)), ((0,), (0,))),
                preferred_element_type=jnp.float32)

        # ---- multi-head self-attention (head dim batched, no per-head loop) ----
        q = bdot(xh, wq[0]) + bq[0]        # (nh, Mb, hd); 1/sqrt(hd) pre-folded
        k = bdot(xh, wk[0]) + bk[0]
        v = bdot(xh, wv[0]) + bv[0]

        s = jax.lax.dot_general(           # scores (nh, Mb, Mb)
            q.astype(jnp.bfloat16), k.astype(jnp.bfloat16),
            dimension_numbers=(((2,), (2,)), ((0,), (0,))),
            preferred_element_type=jnp.float32)
        s = s + bias_ref[...]              # additive PAD / block-diag mask (hoisted)
        s = s - jnp.max(s, axis=-1, keepdims=True)
        p = jnp.exp(s)
        p = p * pl.reciprocal(jnp.sum(p, axis=-1, keepdims=True), approx=True)

        ctx = bdot(p.astype(jnp.bfloat16), v.astype(jnp.bfloat16))       # (nh, Mb, hd)
        proj = bdot(ctx.astype(jnp.bfloat16), wo[0])                     # (nh, Mb, H)
        attn = jnp.sum(proj, axis=0) + bo[0]                             # (Mb, H)

        # ---- residual + LayerNorm 1 (f32) ----
        y = xf + attn
        mu = jnp.mean(y, axis=-1, keepdims=True)
        var = jnp.mean(jnp.square(y - mu), axis=-1, keepdims=True)
        y = (y - mu) * jax.lax.rsqrt(var + LN_EPS) * ln1g[0] + ln1b[0]

        # ---- position-wise feed-forward ----
        f = jnp.dot(y.astype(jnp.bfloat16), w1[0],
                    preferred_element_type=jnp.float32) + b1[0]
        f = jnp.maximum(f, 0.0)
        f = jnp.dot(f.astype(jnp.bfloat16), w2[0],
                    preferred_element_type=jnp.float32) + b2[0]

        # ---- residual + LayerNorm 2 (f32) ----
        z = y + f
        mu2 = jnp.mean(z, axis=-1, keepdims=True)
        var2 = jnp.mean(jnp.square(z - mu2), axis=-1, keepdims=True)
        z = (z - mu2) * jax.lax.rsqrt(var2 + LN_EPS) * ln2g[0] + ln2b[0]

        xacc[...] = z      # stays resident in VMEM for the next layer
        o_ref[...] = z     # written back to HBM only when the batch tile changes

    return kernel


# ----------------------------------------------------------------------------
# Host-side parameter repacking (stack layers, per-head layout, bf16, scale fold)
# ----------------------------------------------------------------------------
def pack_encoder_params(params, n_heads):
    H = params["emb"].shape[1]
    hd = H // n_heads
    inv_scale = 1.0 / math.sqrt(hd)
    layers = params["layers"]
    L = len(layers)

    def stack(name):
        return jnp.stack([p[name] for p in layers], axis=0)

    def heads_in(w):            # (L, H, H) -> (L, nh, H, hd)
        return w.reshape(L, H, n_heads, hd).transpose(0, 2, 1, 3)

    def heads_bias(b):          # (L, 1, H) -> (L, nh, 1, hd)
        return b.reshape(L, 1, n_heads, hd).transpose(0, 2, 1, 3)

    return dict(
        wq=(heads_in(stack("wq")) * inv_scale).astype(jnp.bfloat16),
        bq=(heads_bias(stack("bq")) * inv_scale).astype(jnp.float32),
        wk=heads_in(stack("wk")).astype(jnp.bfloat16),
        bk=heads_bias(stack("bk")).astype(jnp.float32),
        wv=heads_in(stack("wv")).astype(jnp.bfloat16),
        bv=heads_bias(stack("bv")).astype(jnp.float32),
        wo=stack("wo").reshape(L, n_heads, hd, H).astype(jnp.bfloat16),
        bo=stack("bo").astype(jnp.float32),
        ln1g=stack("ln1g").astype(jnp.float32), ln1b=stack("ln1b").astype(jnp.float32),
        w1=stack("w1").astype(jnp.bfloat16), b1=stack("b1").astype(jnp.float32),
        w2=stack("w2").astype(jnp.bfloat16), b2=stack("b2").astype(jnp.float32),
        ln2g=stack("ln2g").astype(jnp.float32), ln2b=stack("ln2b").astype(jnp.float32),
    )


def _pick_batch_tile(batch):
    """Largest Bt dividing B that still leaves >=2 parallel grid steps (v7x: 2 TCs)."""
    if batch <= 1:
        return 1
    for bt in range(batch // 2, 0, -1):
        if batch % bt == 0:
            return bt
    return 1


# ----------------------------------------------------------------------------
# Encoder forward (glue + the fused Pallas kernel)
# ----------------------------------------------------------------------------
def encoder_forward(src, src_mask, params, n_heads, batch_tile=None):
    B, S = src.shape
    H = params["emb"].shape[1]
    L = len(params["layers"])
    hd = H // n_heads
    assert H % n_heads == 0

    bt = _pick_batch_tile(B) if batch_tile is None else batch_tile
    assert B % bt == 0
    n_btiles = B // bt
    mb = bt * S                         # rows per grid step (MXU M dimension)

    # Embedding gathers + scale/add: data-dependent lookups, left to XLA fusion.
    x0 = jnp.take(params["emb"], src, axis=0) * math.sqrt(H) \
        + params["pos_emb"][:S][None]
    x0 = x0.reshape(B * S, H).astype(jnp.float32)

    # Additive attention bias: PAD-key mask (+ block-diagonal when bt > 1).
    key_keep = (src_mask.reshape(B, S) != 0).reshape(n_btiles, 1, mb)
    idx = jnp.arange(mb)
    same_elem = (idx[:, None] // S) == (idx[None, :] // S)          # (Mb, Mb)
    keep = jnp.logical_and(same_elem[None], key_keep)               # (nB, Mb, Mb)
    attn_bias = jnp.where(keep, 0.0, NEG_INF).astype(jnp.float32)

    p = pack_encoder_params(params, n_heads)
    F = p["w1"].shape[-1]

    def layer_spec(shape):
        return pl.BlockSpec((1,) + shape, lambda b, l: (l,) + (0,) * len(shape))

    in_specs = [
        pl.BlockSpec((mb, H), lambda b, l: (b, 0)),            # x0 (read at l == 0)
        pl.BlockSpec((1, mb, mb), lambda b, l: (b, 0, 0)),     # attention bias
        layer_spec((n_heads, H, hd)), layer_spec((n_heads, 1, hd)),   # wq, bq
        layer_spec((n_heads, H, hd)), layer_spec((n_heads, 1, hd)),   # wk, bk
        layer_spec((n_heads, H, hd)), layer_spec((n_heads, 1, hd)),   # wv, bv
        layer_spec((n_heads, hd, H)), layer_spec((1, H)),             # wo, bo
        layer_spec((1, H)), layer_spec((1, H)),                       # ln1g, ln1b
        layer_spec((H, F)), layer_spec((1, F)),                       # w1, b1
        layer_spec((F, H)), layer_spec((1, H)),                       # w2, b2
        layer_spec((1, H)), layer_spec((1, H)),                       # ln2g, ln2b
    ]

    out = pl.pallas_call(
        _make_encoder_kernel(n_heads, hd, H, mb),
        out_shape=jax.ShapeDtypeStruct((B * S, H), jnp.float32),
        grid_spec=pltpu.PrefetchScalarGridSpec(
            num_scalar_prefetch=0,
            grid=(n_btiles, L),                  # layer axis innermost -> residency
            in_specs=in_specs,
            out_specs=pl.BlockSpec((mb, H), lambda b, l: (b, 0)),
            scratch_shapes=[pltpu.VMEM((mb, H), jnp.float32)],   # resident activation
        ),
        compiler_params=pltpu.CompilerParams(
            dimension_semantics=("parallel", "arbitrary"),
            vmem_limit_bytes=32 * 1024 * 1024,   # explicit cap; tiny usage here
        ),
    )(x0, attn_bias,
      p["wq"], p["bq"], p["wk"], p["bk"], p["wv"], p["bv"], p["wo"], p["bo"],
      p["ln1g"], p["ln1b"], p["w1"], p["b1"], p["w2"], p["b2"],
      p["ln2g"], p["ln2b"])

    return out.reshape(B, S, H)


# ----------------------------------------------------------------------------
# deterministic parameter init (f32, PyTorch-style (in, out) weight storage)
# ----------------------------------------------------------------------------
def init_params(key, vocab, H, n_layers, F, max_len):
    k_emb, k_pos, *k_layers = jax.random.split(key, 2 + n_layers)
    params = {
        "emb": jax.random.normal(k_emb, (vocab, H), jnp.float32) * 0.1,
        "pos_emb": jax.random.normal(k_pos, (max_len, H), jnp.float32) * 0.1,
        "layers": [],
    }
    for kl in k_layers:
        ks = jax.random.split(kl, 12)
        lin = lambda k, din, dout: jax.random.normal(k, (din, dout), jnp.float32) / math.sqrt(din)
        bias = lambda k, d: jax.random.normal(k, (1, d), jnp.float32) * 0.01
        params["layers"].append(dict(
            wq=lin(ks[0], H, H), bq=bias(ks[1], H),
            wk=lin(ks[2], H, H), bk=bias(ks[3], H),
            wv=lin(ks[4], H, H), bv=bias(ks[5], H),
            wo=lin(ks[6], H, H), bo=bias(ks[7], H),
            ln1g=jnp.ones((1, H), jnp.float32), ln1b=jnp.zeros((1, H), jnp.float32),
            w1=lin(ks[8], H, F), b1=bias(ks[9], F),
            w2=lin(ks[10], F, H), b2=bias(ks[11], H),
            ln2g=jnp.ones((1, H), jnp.float32), ln2b=jnp.zeros((1, H), jnp.float32),
        ))
    return params


# ----------------------------------------------------------------------------
# pure-JAX f32 reference (mirrors the PyTorch forward, dropout = identity)
# ----------------------------------------------------------------------------
def ref_encoder(src, src_mask, params, n_heads):
    B, S = src.shape
    H = params["emb"].shape[1]
    hd = H // n_heads

    def ln(x, g, b):
        mu = jnp.mean(x, axis=-1, keepdims=True)
        var = jnp.mean((x - mu) ** 2, axis=-1, keepdims=True)
        return (x - mu) * jax.lax.rsqrt(var + LN_EPS) * g + b

    x = jnp.take(params["emb"], src, axis=0) * math.sqrt(H) \
        + jnp.take(params["pos_emb"], jnp.arange(S), axis=0)[None]
    mask = src_mask.reshape(B, 1, 1, S).astype(jnp.float32)
    for p in params["layers"]:
        q = (x @ p["wq"] + p["bq"]).reshape(B, S, n_heads, hd).transpose(0, 2, 1, 3)
        k = (x @ p["wk"] + p["bk"]).reshape(B, S, n_heads, hd).transpose(0, 2, 1, 3)
        v = (x @ p["wv"] + p["bv"]).reshape(B, S, n_heads, hd).transpose(0, 2, 1, 3)
        e = jnp.einsum("bhqd,bhkd->bhqk", q, k) / math.sqrt(hd)
        e = jnp.where(mask == 0.0, NEG_INF, e)
        a = jax.nn.softmax(e, axis=-1)
        o = jnp.einsum("bhqk,bhkd->bhqd", a, v).transpose(0, 2, 1, 3).reshape(B, S, H)
        o = o @ p["wo"] + p["bo"]
        y = ln(x + o, p["ln1g"], p["ln1b"])
        f = jnp.maximum(y @ p["w1"] + p["b1"], 0.0) @ p["w2"] + p["b2"]
        x = ln(y + f, p["ln2g"], p["ln2b"])
    return x


if __name__ == "__main__":
    VOCAB, HIDDEN, N_LAYERS, N_HEADS, POSFF, MAX_LEN = 50, 32, 2, 4, 64, 50
    B, S = 2, 8

    key = jax.random.PRNGKey(0)
    k_params, k_src = jax.random.split(key)
    params = init_params(k_params, VOCAB, HIDDEN, N_LAYERS, POSFF, MAX_LEN)

    src = jax.random.randint(k_src, (B, S), 1, VOCAB, dtype=jnp.int32)
    src = src.at[1, S - 2:].set(0)                       # PAD tokens in batch 1
    src_mask = (src != 0).astype(jnp.float32).reshape(B, 1, 1, S)

    fwd = jax.jit(partial(encoder_forward, n_heads=N_HEADS))
    out = fwd(src, src_mask, params)
    out = jax.block_until_ready(out)

    ref = ref_encoder(src, src_mask, params, N_HEADS)
    assert out.shape == (B, S, HIDDEN)
    # bf16 matmuls with f32 accumulation vs. the all-f32 reference.
    assert jnp.allclose(out, ref, rtol=3e-2, atol=3e-2), "mismatch vs. reference"

    print("KERNEL_OK")
</pallas_src>

<mosaic_0001>
module attributes {stable_mosaic.version = 11 : i64} {
  func.func @kernel(%arg0: i32, %arg1: i32, %arg2: memref<8x32xf32, #tpu.memory_space<vmem>>, %arg3: memref<1x8x8xf32, #tpu.memory_space<vmem>>, %arg4: memref<1x4x32x8xbf16, #tpu.memory_space<vmem>>, %arg5: memref<1x4x1x8xf32, #tpu.memory_space<vmem>>, %arg6: memref<1x4x32x8xbf16, #tpu.memory_space<vmem>>, %arg7: memref<1x4x1x8xf32, #tpu.memory_space<vmem>>, %arg8: memref<1x4x32x8xbf16, #tpu.memory_space<vmem>>, %arg9: memref<1x4x1x8xf32, #tpu.memory_space<vmem>>, %arg10: memref<1x4x8x32xbf16, #tpu.memory_space<vmem>>, %arg11: memref<1x1x32xf32, #tpu.memory_space<vmem>>, %arg12: memref<1x1x32xf32, #tpu.memory_space<vmem>>, %arg13: memref<1x1x32xf32, #tpu.memory_space<vmem>>, %arg14: memref<1x32x64xbf16, #tpu.memory_space<vmem>>, %arg15: memref<1x1x64xf32, #tpu.memory_space<vmem>>, %arg16: memref<1x64x32xbf16, #tpu.memory_space<vmem>>, %arg17: memref<1x1x32xf32, #tpu.memory_space<vmem>>, %arg18: memref<1x1x32xf32, #tpu.memory_space<vmem>>, %arg19: memref<1x1x32xf32, #tpu.memory_space<vmem>>, %arg20: memref<8x32xf32, #tpu.memory_space<vmem>>, %arg21: memref<8x32xf32, #tpu.memory_space<vmem>>) attributes {dimension_semantics = [#tpu.dimension_semantics<parallel>, #tpu.dimension_semantics<arbitrary>], iteration_bounds = array<i64: 2, 2>, scalar_prefetch = 0 : i64, scratch_operands = 1 : i64, tpu.core_type = #tpu.core_type<tc>, window_params = [{transform_indices = @transform_0, window_bounds = array<i64: 8, 32>}, {transform_indices = @transform_1, window_bounds = array<i64: 1, 8, 8>}, {transform_indices = @transform_2, window_bounds = array<i64: 1, 4, 32, 8>}, {transform_indices = @transform_3, window_bounds = array<i64: 1, 4, 1, 8>}, {transform_indices = @transform_4, window_bounds = array<i64: 1, 4, 32, 8>}, {transform_indices = @transform_5, window_bounds = array<i64: 1, 4, 1, 8>}, {transform_indices = @transform_6, window_bounds = array<i64: 1, 4, 32, 8>}, {transform_indices = @transform_7, window_bounds = array<i64: 1, 4, 1, 8>}, {transform_indices = @transform_8, window_bounds = array<i64: 1, 4, 8, 32>}, {transform_indices = @transform_9, window_bounds = array<i64: 1, 1, 32>}, {transform_indices = @transform_10, window_bounds = array<i64: 1, 1, 32>}, {transform_indices = @transform_11, window_bounds = array<i64: 1, 1, 32>}, {transform_indices = @transform_12, window_bounds = array<i64: 1, 32, 64>}, {transform_indices = @transform_13, window_bounds = array<i64: 1, 1, 64>}, {transform_indices = @transform_14, window_bounds = array<i64: 1, 64, 32>}, {transform_indices = @transform_15, window_bounds = array<i64: 1, 1, 32>}, {transform_indices = @transform_16, window_bounds = array<i64: 1, 1, 32>}, {transform_indices = @transform_17, window_bounds = array<i64: 1, 1, 32>}, {transform_indices = @transform_18, window_bounds = array<i64: 8, 32>}]} {
    %c0_i32 = arith.constant 0 : i32
    %0 = arith.cmpi eq, %arg1, %c0_i32 : i32
    %1 = arith.extui %0 : i1 to i32
    %c0_i32_0 = arith.constant 0 : i32
    %2 = arith.cmpi ne, %1, %c0_i32_0 : i32
    scf.if %2 {
      %c0_85 = arith.constant 0 : index
      %c0_86 = arith.constant 0 : index
      %131 = vector.load %arg2[%c0_85, %c0_86] : memref<8x32xf32, #tpu.memory_space<vmem>>, vector<8x32xf32>
      %c0_87 = arith.constant 0 : index
      %c0_88 = arith.constant 0 : index
      %132 = vector.load %arg21[%c0_87, %c0_88] : memref<8x32xf32, #tpu.memory_space<vmem>>, vector<8x32xf32>
      tpu.vector_store %arg21[%c0_87, %c0_88], %131 {strides = array<i32>} : memref<8x32xf32, #tpu.memory_space<vmem>>, vector<8x32xf32>,
    } else {
    }
    %c0 = arith.constant 0 : index
    %c0_1 = arith.constant 0 : index
    %3 = vector.load %arg21[%c0, %c0_1] : memref<8x32xf32, #tpu.memory_space<vmem>>, vector<8x32xf32>
    %4 = arith.truncf %3 : vector<8x32xf32> to vector<8x32xbf16>
    %5 = vector.shape_cast %4 : vector<8x32xbf16> to vector<1x8x32xbf16>
    %6 = vector.shape_cast %5 : vector<1x8x32xbf16> to vector<1x8x32xbf16>
    %7 = vector.broadcast %6 : vector<1x8x32xbf16> to vector<4x8x32xbf16>
    %c0_2 = arith.constant 0 : index
    %c0_3 = arith.constant 0 : index
    %c0_4 = arith.constant 0 : index
    %c0_5 = arith.constant 0 : index
    %8 = vector.load %arg4[%c0_2, %c0_3, %c0_4, %c0_5] : memref<1x4x32x8xbf16, #tpu.memory_space<vmem>>, vector<1x4x32x8xbf16>
    %9 = vector.shape_cast %8 : vector<1x4x32x8xbf16> to vector<4x32x8xbf16>
    %cst = arith.constant dense<0.000000e+00> : vector<4x8x8xf32>
    %10 = tpu.matmul %7, %9, %cst {dimension_numbers = #tpu.dot_dimension_numbers<[2], [1], [1], [2], [0, 0, 0, 1, 1, 2], [0], [0]>} : vector<4x8x32xbf16>, vector<4x32x8xbf16>, vector<4x8x8xf32> -> vector<4x8x8xf32>
    %c0_6 = arith.constant 0 : index
    %c0_7 = arith.constant 0 : index
    %c0_8 = arith.constant 0 : index
    %c0_9 = arith.constant 0 : index
    %11 = vector.load %arg5[%c0_6, %c0_7, %c0_8, %c0_9] : memref<1x4x1x8xf32, #tpu.memory_space<vmem>>, vector<1x4x1x8xf32>
    %12 = vector.shape_cast %11 : vector<1x4x1x8xf32> to vector<4x1x8xf32>
    %13 = vector.broadcast %12 : vector<4x1x8xf32> to vector<4x8x8xf32>
    %14 = arith.addf %10, %13 : vector<4x8x8xf32>
    %c0_10 = arith.constant 0 : index
    %c0_11 = arith.constant 0 : index
    %c0_12 = arith.constant 0 : index
    %c0_13 = arith.constant 0 : index
    %15 = vector.load %arg6[%c0_10, %c0_11, %c0_12, %c0_13] : memref<1x4x32x8xbf16, #tpu.memory_space<vmem>>, vector<1x4x32x8xbf16>
    %16 = vector.shape_cast %15 : vector<1x4x32x8xbf16> to vector<4x32x8xbf16>
    %cst_14 = arith.constant dense<0.000000e+00> : vector<4x8x8xf32>
    %17 = tpu.matmul %7, %16, %cst_14 {dimension_numbers = #tpu.dot_dimension_numbers<[2], [1], [1], [2], [0, 0, 0, 1, 1, 2], [0], [0]>} : vector<4x8x32xbf16>, vector<4x32x8xbf16>, vector<4x8x8xf32> -> vector<4x8x8xf32>
    %c0_15 = arith.constant 0 : index
    %c0_16 = arith.constant 0 : index
    %c0_17 = arith.constant 0 : index
    %c0_18 = arith.constant 0 : index
    %18 = vector.load %arg7[%c0_15, %c0_16, %c0_17, %c0_18] : memref<1x4x1x8xf32, #tpu.memory_space<vmem>>, vector<1x4x1x8xf32>
    %19 = vector.shape_cast %18 : vector<1x4x1x8xf32> to vector<4x1x8xf32>
    %20 = vector.broadcast %19 : vector<4x1x8xf32> to vector<4x8x8xf32>
    %21 = arith.addf %17, %20 : vector<4x8x8xf32>
    %c0_19 = arith.constant 0 : index
    %c0_20 = arith.constant 0 : index
    %c0_21 = arith.constant 0 : index
    %c0_22 = arith.constant 0 : index
    %22 = vector.load %arg8[%c0_19, %c0_20, %c0_21, %c0_22] : memref<1x4x32x8xbf16, #tpu.memory_space<vmem>>, vector<1x4x32x8xbf16>
    %23 = vector.shape_cast %22 : vector<1x4x32x8xbf16> to vector<4x32x8xbf16>
    %cst_23 = arith.constant dense<0.000000e+00> : vector<4x8x8xf32>
    %24 = tpu.matmul %7, %23, %cst_23 {dimension_numbers = #tpu.dot_dimension_numbers<[2], [1], [1], [2], [0, 0, 0, 1, 1, 2], [0], [0]>} : vector<4x8x32xbf16>, vector<4x32x8xbf16>, vector<4x8x8xf32> -> vector<4x8x8xf32>
    %c0_24 = arith.constant 0 : index
    %c0_25 = arith.constant 0 : index
    %c0_26 = arith.constant 0 : index
    %c0_27 = arith.constant 0 : index
    %25 = vector.load %arg9[%c0_24, %c0_25, %c0_26, %c0_27] : memref<1x4x1x8xf32, #tpu.memory_space<vmem>>, vector<1x4x1x8xf32>
    %26 = vector.shape_cast %25 : vector<1x4x1x8xf32> to vector<4x1x8xf32>
    %27 = vector.broadcast %26 : vector<4x1x8xf32> to vector<4x8x8xf32>
    %28 = arith.addf %24, %27 : vector<4x8x8xf32>
    %29 = arith.truncf %14 : vector<4x8x8xf32> to vector<4x8x8xbf16>
    %30 = arith.truncf %21 : vector<4x8x8xf32> to vector<4x8x8xbf16>
    %cst_28 = arith.constant dense<0.000000e+00> : vector<4x8x8xf32>
    %31 = tpu.matmul %29, %30, %cst_28 {dimension_numbers = #tpu.dot_dimension_numbers<[2], [2], [1], [1], [0, 0, 0, 1, 1, 1], [0], [0]>} : vector<4x8x8xbf16>, vector<4x8x8xbf16>, vector<4x8x8xf32> -> vector<4x8x8xf32>
    %c0_29 = arith.constant 0 : index
    %c0_30 = arith.constant 0 : index
    %c0_31 = arith.constant 0 : index
    %32 = vector.load %arg3[%c0_29, %c0_30, %c0_31] : memref<1x8x8xf32, #tpu.memory_space<vmem>>, vector<1x8x8xf32>
    %33 = vector.broadcast %32 : vector<1x8x8xf32> to vector<4x8x8xf32>
    %34 = arith.addf %31, %33 : vector<4x8x8xf32>
    %cst_32 = arith.constant dense<0xFF800000> : vector<4x8xf32>
    %35 = vector.multi_reduction <maximumf>, %34, %cst_32 [2] : vector<4x8x8xf32> to vector<4x8xf32>
    %36 = vector.shape_cast %35 : vector<4x8xf32> to vector<4x8x1xf32>
    %37 = vector.broadcast %36 : vector<4x8x1xf32> to vector<4x8x8xf32>
    %38 = arith.subf %34, %37 : vector<4x8x8xf32>
    %39 = math.exp %38 : vector<4x8x8xf32>
    %cst_33 = arith.constant dense<0.000000e+00> : vector<4x8xf32>
    %40 = vector.multi_reduction <add>, %39, %cst_33 [2] : vector<4x8x8xf32> to vector<4x8xf32>
    %41 = vector.shape_cast %40 : vector<4x8xf32> to vector<4x8x1xf32>
    %42 = tpu.reciprocal %41 {approx = true} : vector<4x8x1xf32> -> vector<4x8x1xf32>
    %43 = vector.broadcast %42 : vector<4x8x1xf32> to vector<4x8x8xf32>
    %44 = arith.mulf %39, %43 : vector<4x8x8xf32>
    %45 = arith.truncf %44 : vector<4x8x8xf32> to vector<4x8x8xbf16>
    %46 = arith.truncf %28 : vector<4x8x8xf32> to vector<4x8x8xbf16>
    %cst_34 = arith.constant dense<0.000000e+00> : vector<4x8x8xf32>
    %47 = tpu.matmul %45, %46, %cst_34 {dimension_numbers = #tpu.dot_dimension_numbers<[2], [1], [1], [2], [0, 0, 0, 1, 1, 2], [0], [0]>} : vector<4x8x8xbf16>, vector<4x8x8xbf16>, vector<4x8x8xf32> -> vector<4x8x8xf32>
    %48 = arith.truncf %47 : vector<4x8x8xf32> to vector<4x8x8xbf16>
    %c0_35 = arith.constant 0 : index
    %c0_36 = arith.constant 0 : index
    %c0_37 = arith.constant 0 : index
    %c0_38 = arith.constant 0 : index
    %49 = vector.load %arg10[%c0_35, %c0_36, %c0_37, %c0_38] : memref<1x4x8x32xbf16, #tpu.memory_space<vmem>>, vector<1x4x8x32xbf16>
    %50 = vector.shape_cast %49 : vector<1x4x8x32xbf16> to vector<4x8x32xbf16>
    %cst_39 = arith.constant dense<0.000000e+00> : vector<4x8x32xf32>
    %51 = tpu.matmul %48, %50, %cst_39 {dimension_numbers = #tpu.dot_dimension_numbers<[2], [1], [1], [2], [0, 0, 0, 1, 1, 2], [0], [0]>} : vector<4x8x8xbf16>, vector<4x8x32xbf16>, vector<4x8x32xf32> -> vector<4x8x32xf32>
    %cst_40 = arith.constant dense<0.000000e+00> : vector<8x32xf32>
    %52 = vector.multi_reduction <add>, %51, %cst_40 [0] : vector<4x8x32xf32> to vector<8x32xf32>
    %c0_41 = arith.constant 0 : index
    %c0_42 = arith.constant 0 : index
    %c0_43 = arith.constant 0 : index
    %53 = vector.load %arg11[%c0_41, %c0_42, %c0_43] : memref<1x1x32xf32, #tpu.memory_space<vmem>>, vector<1x1x32xf32>
    %54 = vector.shape_cast %53 : vector<1x1x32xf32> to vector<1x32xf32>
    %55 = vector.broadcast %54 : vector<1x32xf32> to vector<8x32xf32>
    %56 = arith.addf %52, %55 : vector<8x32xf32>
    %57 = arith.addf %3, %56 : vector<8x32xf32>
    %cst_44 = arith.constant dense<0.000000e+00> : vector<8xf32>
    %58 = vector.multi_reduction <add>, %57, %cst_44 [1] : vector<8x32xf32> to vector<8xf32>
    %59 = vector.shape_cast %58 : vector<8xf32> to vector<8x1xf32>
    %cst_45 = arith.constant 3.200000e+01 : f32
    %60 = vector.broadcast %cst_45 : f32 to vector<8x1xf32>
    %61 = arith.divf %59, %60 : vector<8x1xf32>
    %62 = vector.broadcast %61 : vector<8x1xf32> to vector<8x32xf32>
    %63 = arith.subf %57, %62 : vector<8x32xf32>
    %64 = arith.mulf %63, %63 : vector<8x32xf32>
    %cst_46 = arith.constant dense<0.000000e+00> : vector<8xf32>
    %65 = vector.multi_reduction <add>, %64, %cst_46 [1] : vector<8x32xf32> to vector<8xf32>
    %66 = vector.shape_cast %65 : vector<8xf32> to vector<8x1xf32>
    %cst_47 = arith.constant 3.200000e+01 : f32
    %67 = vector.broadcast %cst_47 : f32 to vector<8x1xf32>
    %68 = arith.divf %66, %67 : vector<8x1xf32>
    %69 = vector.broadcast %61 : vector<8x1xf32> to vector<8x32xf32>
    %70 = arith.subf %57, %69 : vector<8x32xf32>
    %cst_48 = arith.constant 9.99999974E-6 : f32
    %71 = vector.broadcast %cst_48 : f32 to vector<8x1xf32>
    %72 = arith.addf %68, %71 : vector<8x1xf32>
    %73 = math.rsqrt %72 : vector<8x1xf32>
    %74 = vector.broadcast %73 : vector<8x1xf32> to vector<8x32xf32>
    %75 = arith.mulf %70, %74 : vector<8x32xf32>
    %c0_49 = arith.constant 0 : index
    %c0_50 = arith.constant 0 : index
    %c0_51 = arith.constant 0 : index
    %76 = vector.load %arg12[%c0_49, %c0_50, %c0_51] : memref<1x1x32xf32, #tpu.memory_space<vmem>>, vector<1x1x32xf32>
    %77 = vector.shape_cast %76 : vector<1x1x32xf32> to vector<1x32xf32>
    %78 = vector.broadcast %77 : vector<1x32xf32> to vector<8x32xf32>
    %79 = arith.mulf %75, %78 : vector<8x32xf32>
    %c0_52 = arith.constant 0 : index
    %c0_53 = arith.constant 0 : index
    %c0_54 = arith.constant 0 : index
    %80 = vector.load %arg13[%c0_52, %c0_53, %c0_54] : memref<1x1x32xf32, #tpu.memory_space<vmem>>, vector<1x1x32xf32>
    %81 = vector.shape_cast %80 : vector<1x1x32xf32> to vector<1x32xf32>
    %82 = vector.broadcast %81 : vector<1x32xf32> to vector<8x32xf32>
    %83 = arith.addf %79, %82 : vector<8x32xf32>
    %84 = arith.truncf %83 : vector<8x32xf32> to vector<8x32xbf16>
    %c0_55 = arith.constant 0 : index
    %c0_56 = arith.constant 0 : index
    %c0_57 = arith.constant 0 : index
    %85 = vector.load %arg14[%c0_55, %c0_56, %c0_57] : memref<1x32x64xbf16, #tpu.memory_space<vmem>>, vector<1x32x64xbf16>
    %86 = vector.shape_cast %85 : vector<1x32x64xbf16> to vector<32x64xbf16>
    %cst_58 = arith.constant dense<0.000000e+00> : vector<8x64xf32>
    %87 = tpu.matmul %84, %86, %cst_58 {dimension_numbers = #tpu.dot_dimension_numbers<[1], [0], [0], [1], [0, 0, 1, 1], [], []>} : vector<8x32xbf16>, vector<32x64xbf16>, vector<8x64xf32> -> vector<8x64xf32>
    %c0_59 = arith.constant 0 : index
    %c0_60 = arith.constant 0 : index
    %c0_61 = arith.constant 0 : index
    %88 = vector.load %arg15[%c0_59, %c0_60, %c0_61] : memref<1x1x64xf32, #tpu.memory_space<vmem>>, vector<1x1x64xf32>
    %89 = vector.shape_cast %88 : vector<1x1x64xf32> to vector<1x64xf32>
    %90 = vector.broadcast %89 : vector<1x64xf32> to vector<8x64xf32>
    %91 = arith.addf %87, %90 : vector<8x64xf32>
    %cst_62 = arith.constant 0.000000e+00 : f32
    %92 = vector.broadcast %cst_62 : f32 to vector<8x64xf32>
    %93 = arith.maximumf %91, %92 : vector<8x64xf32>
    %94 = arith.truncf %93 : vector<8x64xf32> to vector<8x64xbf16>
    %c0_63 = arith.constant 0 : index
    %c0_64 = arith.constant 0 : index
    %c0_65 = arith.constant 0 : index
    %95 = vector.load %arg16[%c0_63, %c0_64, %c0_65] : memref<1x64x32xbf16, #tpu.memory_space<vmem>>, vector<1x64x32xbf16>
    %96 = vector.shape_cast %95 : vector<1x64x32xbf16> to vector<64x32xbf16>
    %cst_66 = arith.constant dense<0.000000e+00> : vector<8x32xf32>
    %97 = tpu.matmul %94, %96, %cst_66 {dimension_numbers = #tpu.dot_dimension_numbers<[1], [0], [0], [1], [0, 0, 1, 1], [], []>} : vector<8x64xbf16>, vector<64x32xbf16>, vector<8x32xf32> -> vector<8x32xf32>
    %c0_67 = arith.constant 0 : index
    %c0_68 = arith.constant 0 : index
    %c0_69 = arith.constant 0 : index
    %98 = vector.load %arg17[%c0_67, %c0_68, %c0_69] : memref<1x1x32xf32, #tpu.memory_space<vmem>>, vector<1x1x32xf32>
    %99 = vector.shape_cast %98 : vector<1x1x32xf32> to vector<1x32xf32>
    %100 = vector.broadcast %99 : vector<1x32xf32> to vector<8x32xf32>
    %101 = arith.addf %97, %100 : vector<8x32xf32>
    %102 = arith.addf %83, %101 : vector<8x32xf32>
    %cst_70 = arith.constant dense<0.000000e+00> : vector<8xf32>
    %103 = vector.multi_reduction <add>, %102, %cst_70 [1] : vector<8x32xf32> to vector<8xf32>
    %104 = vector.shape_cast %103 : vector<8xf32> to vector<8x1xf32>
    %cst_71 = arith.constant 3.200000e+01 : f32
    %105 = vector.broadcast %cst_71 : f32 to vector<8x1xf32>
    %106 = arith.divf %104, %105 : vector<8x1xf32>
    %107 = vector.broadcast %106 : vector<8x1xf32> to vector<8x32xf32>
    %108 = arith.subf %102, %107 : vector<8x32xf32>
    %109 = arith.mulf %108, %108 : vector<8x32xf32>
    %cst_72 = arith.constant dense<0.000000e+00> : vector<8xf32>
    %110 = vector.multi_reduction <add>, %109, %cst_72 [1] : vector<8x32xf32> to vector<8xf32>
    %111 = vector.shape_cast %110 : vector<8xf32> to vector<8x1xf32>
    %cst_73 = arith.constant 3.200000e+01 : f32
    %112 = vector.broadcast %cst_73 : f32 to vector<8x1xf32>
    %113 = arith.divf %111, %112 : vector<8x1xf32>
    %114 = vector.broadcast %106 : vector<8x1xf32> to vector<8x32xf32>
    %115 = arith.subf %102, %114 : vector<8x32xf32>
    %cst_74 = arith.constant 9.99999974E-6 : f32
    %116 = vector.broadcast %cst_74 : f32 to vector<8x1xf32>
    %117 = arith.addf %113, %116 : vector<8x1xf32>
    %118 = math.rsqrt %117 : vector<8x1xf32>
    %119 = vector.broadcast %118 : vector<8x1xf32> to vector<8x32xf32>
    %120 = arith.mulf %115, %119 : vector<8x32xf32>
    %c0_75 = arith.constant 0 : index
    %c0_76 = arith.constant 0 : index
    %c0_77 = arith.constant 0 : index
    %121 = vector.load %arg18[%c0_75, %c0_76, %c0_77] : memref<1x1x32xf32, #tpu.memory_space<vmem>>, vector<1x1x32xf32>
    %122 = vector.shape_cast %121 : vector<1x1x32xf32> to vector<1x32xf32>
    %123 = vector.broadcast %122 : vector<1x32xf32> to vector<8x32xf32>
    %124 = arith.mulf %120, %123 : vector<8x32xf32>
    %c0_78 = arith.constant 0 : index
    %c0_79 = arith.constant 0 : index
    %c0_80 = arith.constant 0 : index
    %125 = vector.load %arg19[%c0_78, %c0_79, %c0_80] : memref<1x1x32xf32, #tpu.memory_space<vmem>>, vector<1x1x32xf32>
    %126 = vector.shape_cast %125 : vector<1x1x32xf32> to vector<1x32xf32>
    %127 = vector.broadcast %126 : vector<1x32xf32> to vector<8x32xf32>
    %128 = arith.addf %124, %127 : vector<8x32xf32>
    %c0_81 = arith.constant 0 : index
    %c0_82 = arith.constant 0 : index
    %129 = vector.load %arg21[%c0_81, %c0_82] : memref<8x32xf32, #tpu.memory_space<vmem>>, vector<8x32xf32>
    tpu.vector_store %arg21[%c0_81, %c0_82], %128 {strides = array<i32>} : memref<8x32xf32, #tpu.memory_space<vmem>>, vector<8x32xf32>,
    %c0_83 = arith.constant 0 : index
    %c0_84 = arith.constant 0 : index
    %130 = vector.load %arg20[%c0_83, %c0_84] : memref<8x32xf32, #tpu.memory_space<vmem>>, vector<8x32xf32>
    tpu.vector_store %arg20[%c0_83, %c0_84], %128 {strides = array<i32>} : memref<8x32xf32, #tpu.memory_space<vmem>>, vector<8x32xf32>,
    return
  }
  func.func @transform_0(%arg0: i32, %arg1: i32) -> (i32, i32) {
    %c0_i32 = arith.constant 0 : i32
    %c0_i32_0 = arith.constant 0 : i32
    return %arg0, %c0_i32 : i32, i32
  }
  func.func @transform_1(%arg0: i32, %arg1: i32) -> (i32, i32, i32) {
    %c0_i32 = arith.constant 0 : i32
    %c0_i32_0 = arith.constant 0 : i32
    %c0_i32_1 = arith.constant 0 : i32
    return %arg0, %c0_i32, %c0_i32_0 : i32, i32, i32
  }
  func.func @transform_2(%arg0: i32, %arg1: i32) -> (i32, i32, i32, i32) {
    %c0_i32 = arith.constant 0 : i32
    %c0_i32_0 = arith.constant 0 : i32
    %c0_i32_1 = arith.constant 0 : i32
    %c0_i32_2 = arith.constant 0 : i32
    return %arg1, %c0_i32, %c0_i32_0, %c0_i32_1 : i32, i32, i32, i32
  }
  func.func @transform_3(%arg0: i32, %arg1: i32) -> (i32, i32, i32, i32) {
    %c0_i32 = arith.constant 0 : i32
    %c0_i32_0 = arith.constant 0 : i32
    %c0_i32_1 = arith.constant 0 : i32
    %c0_i32_2 = arith.constant 0 : i32
    return %arg1, %c0_i32, %c0_i32_0, %c0_i32_1 : i32, i32, i32, i32
  }
  func.func @transform_4(%arg0: i32, %arg1: i32) -> (i32, i32, i32, i32) {
    %c0_i32 = arith.constant 0 : i32
    %c0_i32_0 = arith.constant 0 : i32
    %c0_i32_1 = arith.constant 0 : i32
    %c0_i32_2 = arith.constant 0 : i32
    return %arg1, %c0_i32, %c0_i32_0, %c0_i32_1 : i32, i32, i32, i32
  }
  func.func @transform_5(%arg0: i32, %arg1: i32) -> (i32, i32, i32, i32) {
    %c0_i32 = arith.constant 0 : i32
    %c0_i32_0 = arith.constant 0 : i32
    %c0_i32_1 = arith.constant 0 : i32
    %c0_i32_2 = arith.constant 0 : i32
    return %arg1, %c0_i32, %c0_i32_0, %c0_i32_1 : i32, i32, i32, i32
  }
  func.func @transform_6(%arg0: i32, %arg1: i32) -> (i32, i32, i32, i32) {
    %c0_i32 = arith.constant 0 : i32
    %c0_i32_0 = arith.constant 0 : i32
    %c0_i32_1 = arith.constant 0 : i32
    %c0_i32_2 = arith.constant 0 : i32
    return %arg1, %c0_i32, %c0_i32_0, %c0_i32_1 : i32, i32, i32, i32
  }
  func.func @transform_7(%arg0: i32, %arg1: i32) -> (i32, i32, i32, i32) {
    %c0_i32 = arith.constant 0 : i32
    %c0_i32_0 = arith.constant 0 : i32
    %c0_i32_1 = arith.constant 0 : i32
    %c0_i32_2 = arith.constant 0 : i32
    return %arg1, %c0_i32, %c0_i32_0, %c0_i32_1 : i32, i32, i32, i32
  }
  func.func @transform_8(%arg0: i32, %arg1: i32) -> (i32, i32, i32, i32) {
    %c0_i32 = arith.constant 0 : i32
    %c0_i32_0 = arith.constant 0 : i32
    %c0_i32_1 = arith.constant 0 : i32
    %c0_i32_2 = arith.constant 0 : i32
    return %arg1, %c0_i32, %c0_i32_0, %c0_i32_1 : i32, i32, i32, i32
  }
  func.func @transform_9(%arg0: i32, %arg1: i32) -> (i32, i32, i32) {
    %c0_i32 = arith.constant 0 : i32
    %c0_i32_0 = arith.constant 0 : i32
    %c0_i32_1 = arith.constant 0 : i32
    return %arg1, %c0_i32, %c0_i32_0 : i32, i32, i32
  }
  func.func @transform_10(%arg0: i32, %arg1: i32) -> (i32, i32, i32) {
    %c0_i32 = arith.constant 0 : i32
    %c0_i32_0 = arith.constant 0 : i32
    %c0_i32_1 = arith.constant 0 : i32
    return %arg1, %c0_i32, %c0_i32_0 : i32, i32, i32
  }
  func.func @transform_11(%arg0: i32, %arg1: i32) -> (i32, i32, i32) {
    %c0_i32 = arith.constant 0 : i32
    %c0_i32_0 = arith.constant 0 : i32
    %c0_i32_1 = arith.constant 0 : i32
    return %arg1, %c0_i32, %c0_i32_0 : i32, i32, i32
  }
  func.func @transform_12(%arg0: i32, %arg1: i32) -> (i32, i32, i32) {
    %c0_i32 = arith.constant 0 : i32
    %c0_i32_0 = arith.constant 0 : i32
    %c0_i32_1 = arith.constant 0 : i32
    return %arg1, %c0_i32, %c0_i32_0 : i32, i32, i32
  }
  func.func @transform_13(%arg0: i32, %arg1: i32) -> (i32, i32, i32) {
    %c0_i32 = arith.constant 0 : i32
    %c0_i32_0 = arith.constant 0 : i32
    %c0_i32_1 = arith.constant 0 : i32
    return %arg1, %c0_i32, %c0_i32_0 : i32, i32, i32
  }
  func.func @transform_14(%arg0: i32, %arg1: i32) -> (i32, i32, i32) {
    %c0_i32 = arith.constant 0 : i32
    %c0_i32_0 = arith.constant 0 : i32
    %c0_i32_1 = arith.constant 0 : i32
    return %arg1, %c0_i32, %c0_i32_0 : i32, i32, i32
  }
  func.func @transform_15(%arg0: i32, %arg1: i32) -> (i32, i32, i32) {
    %c0_i32 = arith.constant 0 : i32
    %c0_i32_0 = arith.constant 0 : i32
    %c0_i32_1 = arith.constant 0 : i32
    return %arg1, %c0_i32, %c0_i32_0 : i32, i32, i32
  }
  func.func @transform_16(%arg0: i32, %arg1: i32) -> (i32, i32, i32) {
    %c0_i32 = arith.constant 0 : i32
    %c0_i32_0 = arith.constant 0 : i32
    %c0_i32_1 = arith.constant 0 : i32
    return %arg1, %c0_i32, %c0_i32_0 : i32, i32, i32
  }
  func.func @transform_17(%arg0: i32, %arg1: i32) -> (i32, i32, i32) {
    %c0_i32 = arith.constant 0 : i32
    %c0_i32_0 = arith.constant 0 : i32
    %c0_i32_1 = arith.constant 0 : i32
    return %arg1, %c0_i32, %c0_i32_0 : i32, i32, i32
  }
  func.func @transform_18(%arg0: i32, %arg1: i32) -> (i32, i32) {
    %c0_i32 = arith.constant 0 : i32
    %c0_i32_0 = arith.constant 0 : i32
    return %arg0, %c0_i32 : i32, i32
  }
}

</mosaic_0001>

<bundles_post_ra>
// kernel: encoder_forward.1
= control target key start
LH: loop header
LB: loop body
LE: loop exit
PB: predicated region body
PF: predicated region fallthrough
CT: control target
= control target key end

     0   :  { %s2898_s0 = inlined_call_operand.vmem [shape: f32[16,32], index: 0, kind: input, shape index: {}]   ;;  %s2899_s1 = inlined_call_operand.vmem [shape: f32[2,8,8], index: 1, kind: input, shape index: {}]   ;;  %s2900_s2 = inlined_call_operand.vmem [shape: bf16[2,4,32,8], index: 2, kind: input, shape index: {}]   ;;  %s2901_s3 = inlined_call_operand.vmem [shape: f32[2,4,1,8], index: 3, kind: input, shape index: {}]   ;;  %s2902_s4 = inlined_call_operand.vmem [shape: bf16[2,4,32,8], index: 4, kind: input, shape index: {}]   ;;  %s2903_s5 = inlined_call_operand.vmem [shape: f32[2,4,1,8], index: 5, kind: input, shape index: {}]   ;;  %s2904_s6 = inlined_call_operand.vmem [shape: bf16[2,4,32,8], index: 6, kind: input, shape index: {}]   ;;  %s2905_s7 = inlined_call_operand.vmem [shape: f32[2,4,1,8], index: 7, kind: input, shape index: {}]   ;;  %s2906_s8 = inlined_call_operand.vmem [shape: bf16[2,4,8,32], index: 8, kind: input, shape index: {}]   ;;  %s2907_s9 = inlined_call_operand.vmem [shape: f32[2,1,32], index: 9, kind: input, shape index: {}]   ;;  %s2908_s10 = inlined_call_operand.vmem [shape: f32[2,1,32], index: 10, kind: input, shape index: {}]   ;;  %s2909_s11 = inlined_call_operand.vmem [shape: f32[2,1,32], index: 11, kind: input, shape index: {}]   ;;  %s2910_s12 = inlined_call_operand.vmem [shape: bf16[2,32,64], index: 12, kind: input, shape index: {}]   ;;  %s2911_s13 = inlined_call_operand.vmem [shape: f32[2,1,64], index: 13, kind: input, shape index: {}]   ;;  %s2912_s14 = inlined_call_operand.vmem [shape: bf16[2,64,32], index: 14, kind: input, shape index: {}]   ;;  %s2913_s15 = inlined_call_operand.vmem [shape: f32[2,1,32], index: 15, kind: input, shape index: {}]   ;;  %s2914_s16 = inlined_call_operand.vmem [shape: f32[2,1,32], index: 16, kind: input, shape index: {}]   ;;  %s2915_s17 = inlined_call_operand.vmem [shape: f32[2,1,32], index: 17, kind: input, shape index: {}]   ;;  %s2916_s18 = inlined_call_operand.hbm [shape: f32[16,32], index: 18, kind: output, shape index: {}]  }
   0x1   :  { %2934 = sst [smem:[#allocation22_spill]] %s2898_s0 }
   0x2   :  { %2935 = sst [smem:[#allocation23_spill]] %s2899_s1 }
   0x3   :  { %2936 = sst [smem:[#allocation24_spill]] %s2900_s2 }
   0x4   :  { %2937 = sst [smem:[#allocation25_spill]] %s2901_s3 }
   0x5   :  { %2938 = sst [smem:[#allocation26_spill]] %s2902_s4 }
   0x6   :  { %2939 = sst [smem:[#allocation27_spill]] %s2903_s5 }
   0x7   :  { %2940 = sst [smem:[#allocation28_spill]] %s2904_s6 }
   0x8   :  { %2941 = sst [smem:[#allocation29_spill]] %s2905_s7 }
   0x9   :  { %2942 = sst [smem:[#allocation30_spill]] %s2906_s8 }
   0xa   :  { %2943 = sst [smem:[#allocation31_spill]] %s2908_s10 }
   0xb   :  { %2944 = sst [smem:[#allocation32_spill]] %s2909_s11 }
   0xc   :  { %2945 = sst [smem:[#allocation33_spill]] %s2910_s12 }
   0xd   :  { %2946 = sst [smem:[#allocation34_spill]] %s2913_s15 }
   0xe   :  { %2947 = sst [smem:[#allocation35_spill]] %s2914_s16 }
   0xf   :  { %2948 = sst [smem:[#allocation36_spill]] %s2915_s17 }
  0x10   :  { %2949 = sst [smem:[#allocation37_spill]] %s2916_s18 }
  0x11   :  { %23 = vsyncpa [#allocation4], 0 }
  0x12   :  { %25 = vsyncpa [#allocation4 + $0x1], 0  ;;  %s2541_s27 = smov 0   ;;  %s2543_s28 = smov 0  }
  0x13   :  { %s2545_s29 = smov 0   ;;  %s2547_s30 = smov 0  }
  0x14   :  { %s2549_s0 = smov 0   ;;  %s2551_s19 = smov 0  }
  0x15   :  { %s2553_s1 = smov 0   ;;  %s2555_s20 = smov 0  }
  0x16 LB: > { %2950 = sst [smem:[#allocation6_spill]] %s2415_s27  ;;  %s2026_s21 = sadd.s32 4294967295, %s2443_s20   ;;  %s2443_s20 = sphi %s2555_s20, %s31_s20   ;;  %s2439_s1 = sphi %s2553_s1, %s3009_s1   ;;  %s2435_s19 = sphi %s2551_s19, %s3008_s19   ;;  %s2431_s0 = sphi %s2549_s0, %s3007_s0   ;;  %s2427_s30 = sphi %s2547_s30, %s3006_s30   ;;  %s2423_s29 = sphi %s2545_s29, %s3005_s29   ;;  %s2419_s28 = sphi %s2543_s28, %s3004_s28   ;;  %s2415_s27 = sphi %s2541_s27, %s3003_s27  }
  0x17   : > { %2951 = sst [smem:[#allocation7_spill]] %s2419_s28  ;;  %s2027_s22 = sadd.s32 4294967294, %s2443_s20  }
  0x18   : > { %2952 = sst [smem:[#allocation8_spill]] %s2423_s29  ;;  %s40_s2 = sadd.s32 1, %s2435_s19 }
  0x19   : > { %2953 = sst [smem:[#allocation9_spill]] %s2427_s30  ;;  %p41_p0 = scmp.ge.s32.totalorder %s40_s2, 2 }
  0x1a   : > { %2954 = sst [smem:[#allocation10_spill]] %s2431_s0  ;;  %s43_s23 = sadd.s32 1, %s2439_s1 }
  0x1b   : > { %2955 = sst [smem:[#allocation11_spill]] %s2435_s19  ;;  %p528_p1 = scmp.ne.s32.totalorder %s2423_s29, %s2419_s28 }
  0x1c   : > { %2956 = sst [smem:[#allocation12_spill]] %s2439_s1  ;;  %p529_p2 = scmp.eq.s32.totalorder %s2026_s21, 3 }
  0x1d   : > { %2957 = sst [smem:[#allocation13_spill]] %s2443_s20  ;;  %s3011_s2 = smov (%p41_p0, %s40_s2), 0 }
  0x1e   : > { %2958 = sst [smem:[#allocation14_spill]] %s3011_s2  ;;  %s3013_s23 = smov (!%p41_p0, %s43_s23), %s2439_s1 }
  0x1f   : > { %p2590_p3 = por %p529_p2, %p528_p1  ;;  %p534_p4 = scmp.ne.s32.totalorder %s2419_s28, %s2415_s27 }
  0x20   : > { %p45_p5 = scmp.ge.s32.totalorder %s3013_s23, 2  ;;  %p535_p6 = scmp.eq.s32.totalorder %s2027_s22, 3 }
  0x21   : > { %s2959_s24 = scalar_select %p2590_p3, 1, 0 }
  0x22   : > { %p2030_p7 = scmp.ge.s32.totalorder %s2443_s20, 1  ;;  %p678_p8 = scmp.lt.s32.totalorder %s2443_s20, 5 }
  0x23   : > { %2960 = sst [smem:[#allocation15_spill]] %s2959_s24  ;;  %s3015_s23 = smov (%p45_p5, %s3013_s23), 0 }
  0x24   : > { %2961 = sst [smem:[#allocation16_spill]] %s3015_s23  ;;  %p2600_p9 = por %p535_p6, %p534_p4 }
  0x25   : > { %p679_p10 = pnand %p2030_p7, %p678_p8  ;;  %s515_s26 = ssub.s32 %s2439_s1, %s3015_s23 }
  0x26   : > { %s2962_s25 = scalar_select %p2600_p9, 1, 0 }
  0x27   : > { %s518_s21 = sadd.s32 1, %s2423_s29  ;;  %p516_p11 = scmp.eq.s32.totalorder %s515_s26, 0 }
  0x28   : > { %2963 = sst [smem:[#allocation17_spill]] %s2962_s25  ;;  %682 = sbr.rel (%p679_p10) target bundleno = 1728 (0x6c0), region = 92 }
  0x29   : > { %s2608_s2 = scalar_select %p516_p11, %s2423_s29, %s518_s21  }
  0x2b   : > { %2964 = sst [smem:[#allocation18_spill]] %s2608_s2 }
  0x2d   : > { %s2927_s22 = sand.u32 1, %s2419_s28   ;;  %p798_p12 = scmp.lt.s32.totalorder %s2431_s0, 1 }
  0x2e   : > { %s2614_s19 = sshll.u32 %s2927_s22, 3  ;;  %p806_p13 = scmp.lt.s32.totalorder %s2427_s30, 1 }
  0x2f   : > { %s799_s25 = scalar_select %p798_p12, %s2431_s0, 1 }
  0x30   : > { %s2619_s27 = scalar_select %p806_p13, %s2427_s30, 1 }
  0x31   : > { %s2032_s26 = sshll.u32 %s799_s25, 3  ;;  %s2965_s1 = sld [smem:[#allocation22_spill]] }
  0x32   : > { %s2966_s24 = sld [smem:[#allocation23_spill]]  ;;  %s2200_s18 = sshll.u32 %s2619_s27, 6 }
  0x33   : > { %s2036_s28 = sshll.u32 %s2619_s27, 2  ;;  %s2968_s17 = sld [smem:[#allocation24_spill]] }
  0x34   : > { %s2969_s3 = sld [smem:[#allocation25_spill]]  ;;  %s2203_s23 = sshll.u32 %s2619_s27, 4 }
  0x35   : > { %s2971_s4 = sld [smem:[#allocation26_spill]] }
  0x36   : > { %s2972_s5 = sld [smem:[#allocation27_spill]] }
  0x37   : > { %s801_s2 = scalar_lea.vmem %s2965_s1, %s2032_s26  ;;  %s2974_s6 = sld [smem:[#allocation28_spill]] }
  0x38   : > { %s2627_s22 = scalar_lea.vmem %s2966_s24, %s2032_s26  ;;  %s2975_s7 = sld [smem:[#allocation29_spill]] }
  0x39   : > { %2967 = sst [smem:[#allocation19_spill]] %s2627_s22  ;;  %s2634_s16 = scalar_lea.vmem %s2968_s17, %s2200_s18 }
  0x3a   : > { %s2639_s1 = scalar_lea.vmem %s2969_s3, %s2036_s28  ;;  %s2976_s8 = sld [smem:[#allocation30_spill]] }
  0x3b   : > { %2970 = sst [smem:[#allocation20_spill]] %s2639_s1  ;;  %s2644_s20 = scalar_lea.vmem %s2971_s4, %s2200_s18 }
  0x3c   : > { %s2649_s30 = scalar_lea.vmem %s2972_s5, %s2036_s28  ;;  %s2979_s12 = sld [smem:[#allocation33_spill]] }
  0x3d   : > { %2973 = sst [smem:[#allocation21_spill]] %s2649_s30  ;;  %s2654_s21 = scalar_lea.vmem %s2974_s6, %s2200_s18 }
  0x3e   : > { %s2659_s3 = scalar_lea.vmem %s2975_s7, %s2036_s28  ;;  %s854_s22 = scalar_lea.vmem %s2911_s13, %s2619_s27 }
  0x3f   : > { %s2205_s1 = sshll.u32 %s2619_s27, 5  ;;  %s2980_s18 = sld [smem:[#allocation34_spill]] }
  0x40   : > { %s2669_s26 = scalar_lea.vmem %s2976_s8, %s2203_s23  ;;  %s2692_s8 = scalar_lea.vmem %s2912_s14, %s2205_s1 }
  0x41   : > { %s2981_s11 = sld [smem:[#allocation35_spill]]  ;;  %s797_s4 = scalar_lea.vmem [#allocation3], %s2614_s19 }
  0x42   : > { %s2682_s6 = scalar_lea.vmem %s2979_s12, %s2203_s23  ;;  %s2982_s12 = sld [smem:[#allocation36_spill]] }
  0x43   : > { %s2983_s29 = sld [smem:[#allocation9_spill]] }
  0x45   : > { %s862_s17 = scalar_lea.vmem %s2980_s18, %s2619_s27 }
  0x47   : > { %s865_s28 = scalar_lea.vmem %s2981_s11, %s2619_s27 }
  0x48   : > { %s868_s10 = scalar_lea.vmem %s2982_s12, %s2619_s27 }
  0x49   : > { %p2049_p0 = scmp.ne.s32.totalorder %s2983_s29, 0 }
  0x4b   : > { %873 = sbr.rel (%p2049_p0) target bundleno = 82 (0x52), region = 96 }
  0x50   : > { %v874_v0 = vld [vmem:[%s801_s2] sm:$0xff]  ;;  %vm875_vm0 = vcmask 261120  }
  0x51   : > { %876 = vst.msk [vmem:[#allocation2] sm:$0xff] %vm875_vm0, %v874_v0 }
  0x52 PF: > { %v2207_v1 = vld [vmem:[%s2634_s16 + $0x8] sm:$0xff]  ;;  %v2209_v2 = vld [vmem:[%s2634_s16 + $0x18] sm:$0xff]  ;;  %v2206_v5 = vld [vmem:[%s2634_s16] sm:$0xff]  ;;  %vm923_vm1 = vcmask 261120   ;;  %s2984_s7 = sld [smem:[#allocation21_spill]]  ;;  %vm1288_vm2 = vcmask 64512   ;;  %s2987_s2 = scalar_lea.vmem %s2907_s9, %s2619_s27 }
  0x53   : > { %v2211_v3 = vld [vmem:[%s2634_s16 + $0x28] sm:$0xff]  ;;  %v2213_v4 = vld [vmem:[%s2634_s16 + $0x38] sm:$0xff]  ;;  %933 = vmatpush.bf16.msra.mxu0 %v2207_v1  ;;  %958 = vmatpush.bf16.msra.mxu1 %v2209_v2  ;;  %v2208_v6 = vld [vmem:[%s2634_s16 + $0x10] sm:$0xff]  ;;  %s2985_s11 = sld [smem:[#allocation20_spill]]  ;;  %vm1420_vm3 = vcmask 1043456   ;;  %vm1705_vm8 = vcmask 523264  }
  0x54   : > { %983 = vmatpush.bf16.msra.mxu2 %v2211_v3  ;;  %1008 = vmatpush.bf16.msra.mxu3 %v2213_v4  ;;  %v2210_v8 = vld [vmem:[%s2634_s16 + $0x20] sm:$0xff]  ;;  %v2212_v9 = vld [vmem:[%s2634_s16 + $0x30] sm:$0xff]  ;;  %v2215_v10 = vld [vmem:[%s2644_s20 + $0x8] sm:$0xff]  ;;  %s2986_s12 = sld [smem:[#allocation19_spill]]  ;;  %s1770_s18 = sshll.u32 %s797_s4, 4  ;;  %s1771_s18 = int_to_ptr.vmem [resolvable:$true] %s1770_s18 }
  0x55   : > { %v2217_v11 = vld [vmem:[%s2644_s20 + $0x18] sm:$0xff]  ;;  %v2219_v13 = vld [vmem:[%s2644_s20 + $0x28] sm:$0xff]  ;;  %v2214_v15 = vld [vmem:[%s2644_s20] sm:$0xff]  ;;  %s2990_s1 = sld [smem:[#allocation32_spill]] }
  0x56   : > { %v2221_v14 = vld [vmem:[%s2644_s20 + $0x38] sm:$0xff]  ;;  %v2216_v16 = vld [vmem:[%s2644_s20 + $0x10] sm:$0xff]  ;;  %v2218_v17 = vld [vmem:[%s2644_s20 + $0x20] sm:$0xff]  ;;  %s2996_s16 = sld [smem:[#allocation37_spill]] }
  0x57   : > { %934 = vmatpush.bf16.msra.mxu0 %v2206_v5  ;;  %959 = vmatpush.bf16.msra.mxu1 %v2208_v6  ;;  %v2220_v18 = vld [vmem:[%s2644_s20 + $0x30] sm:$0xff]  ;;  %v2227_v19 = vld [vmem:[%s2654_s21 + $0x28] sm:$0xff]  ;;  %v2225_v21 = vld [vmem:[%s2654_s21 + $0x18] sm:$0xff] }
  0x58   : > { %v2714_v7 = vld [vmem:[#allocation2] sm:$0xff]  ;;  %984 = vmatpush.bf16.msra.mxu2 %v2210_v8  ;;  %1009 = vmatpush.bf16.msra.mxu3 %v2212_v9  ;;  %v2223_v20 = vld [vmem:[%s2654_s21 + $0x8] sm:$0xff]  ;;  %v2224_v24 = vld [vmem:[%s2654_s21 + $0x10] sm:$0xff] }
  0x59   : > { %v878_v12 = vpack.c.bf16 %v2714_v7, %v2714_v7  ;;  %v2226_v22 = vld [vmem:[%s2654_s21 + $0x20] sm:$0xff]  ;;  %v2229_v25 = vld [vmem:[%s2654_s21 + $0x38] sm:$0xff]  ;;  %v2228_v26 = vld [vmem:[%s2654_s21 + $0x30] sm:$0xff] }
  0x5a   : > { %v2222_v23 = vld [vmem:[%s2654_s21] sm:$0xff]  ;;  %s2988_s21 = sld [smem:[#allocation31_spill]] }
  0x5b   : > { %1065 = vmatpush.bf16.msrb.mxu0 %v2215_v10  ;;  %1090 = vmatpush.bf16.msrb.mxu1 %v2217_v11  ;;  %v2312_v33 = vld [vmem:[%s2984_s7] ss:$0 sm:$0xff]  ;;  %v2313_v34 = vld [vmem:[%s2984_s7 + $0x1] ss:$0 sm:$0xff]  ;;  %v2314_v45 = vld [vmem:[%s2984_s7 + $0x2] ss:$0 sm:$0xff]  ;;  %s2991_s24 = scalar_lea.vmem %s2990_s1, %s2619_s27 }
  0x5c   : > { %2058 = vmatmul.msk.bf16.vlgmr.msra.gmra.mxu0 %vm923_vm1, %v878_v12  ;;  %2067 = vmatmul.msk.bf16.vlgmr.msra.gmra.mxu1 %vm923_vm1, %v878_v12  ;;  %v2309_v41 = vld [vmem:[%s2985_s11 + $0x1] ss:$0 sm:$0xff]  ;;  %v2308_v44 = vld [vmem:[%s2985_s11] ss:$0 sm:$0xff]  ;;  %v2315_v46 = vld [vmem:[%s2984_s7 + $0x3] ss:$0 sm:$0xff] }
  0x5d   : > { %2076 = vmatmul.msk.bf16.vlgmr.msra.gmra.mxu2 %vm923_vm1, %v878_v12  ;;  %2085 = vmatmul.msk.bf16.vlgmr.msra.gmra.mxu3 %vm923_vm1, %v878_v12  ;;  %v2310_v58 = vld [vmem:[%s2985_s11 + $0x2] ss:$0 sm:$0xff]  ;;  %v2311_v59 = vld [vmem:[%s2985_s11 + $0x3] ss:$0 sm:$0xff]  ;;  %v2316_v8 = vld [vmem:[%s2659_s3] ss:$0 sm:$0xff] }
  0x5e   : > { %1115 = vmatpush.bf16.msrb.mxu2 %v2219_v13  ;;  %1140 = vmatpush.bf16.msrb.mxu3 %v2221_v14  ;;  %v2317_v9 = vld [vmem:[%s2659_s3 + $0x1] ss:$0 sm:$0xff]  ;;  %v2318_v14 = vld [vmem:[%s2659_s3 + $0x2] ss:$0 sm:$0xff]  ;;  %s2369_s30 = scalar_lea.hbm %s2996_s16, 16 }
  0x5f   : > { %1066 = vmatpush.bf16.msrb.mxu0 %v2214_v15  ;;  %1091 = vmatpush.bf16.msrb.mxu1 %v2216_v16 }
  0x62   : > { %1116 = vmatpush.bf16.msrb.mxu2 %v2218_v17  ;;  %1141 = vmatpush.bf16.msrb.mxu3 %v2220_v18 }
  0x63   : > { %1197 = vmatpush.bf16.msra.mxu0 %v2223_v20  ;;  %1222 = vmatpush.bf16.msra.mxu1 %v2225_v21 }
  0x66   : > { %1247 = vmatpush.bf16.msra.mxu2 %v2227_v19  ;;  %1272 = vmatpush.bf16.msra.mxu3 %v2229_v25  ;;  %v2319_v25 = vld [vmem:[%s2659_s3 + $0x3] ss:$0 sm:$0xff] }
  0x67   : > { %1198 = vmatpush.bf16.msra.mxu0 %v2222_v23  ;;  %1223 = vmatpush.bf16.msra.mxu1 %v2224_v24 }
  0x6a   : > { %1248 = vmatpush.bf16.msra.mxu2 %v2226_v22  ;;  %1273 = vmatpush.bf16.msra.mxu3 %v2228_v26 }
  0x6c   : > { %2094 = vmatmul.msk.bf16.vlgmr.msrb.gmra.mxu0 %vm923_vm1, %v878_v12  ;;  %2103 = vmatmul.msk.bf16.vlgmr.msrb.gmra.mxu1 %vm923_vm1, %v878_v12 }
  0x6d   : > { %2112 = vmatmul.msk.bf16.vlgmr.msrb.gmra.mxu2 %vm923_vm1, %v878_v12  ;;  %2121 = vmatmul.msk.bf16.vlgmr.msrb.gmra.mxu3 %vm923_vm1, %v878_v12 }
  0x7c   : > { %2130 = vmatmul.msk.bf16.vlgmr.msra.gmra.mxu0 %vm923_vm1, %v878_v12  ;;  %2139 = vmatmul.msk.bf16.vlgmr.msra.gmra.mxu1 %vm923_vm1, %v878_v12 }
  0x7d   : > { %2148 = vmatmul.msk.bf16.vlgmr.msra.gmra.mxu2 %vm923_vm1, %v878_v12  ;;  %2157 = vmatmul.msk.bf16.vlgmr.msra.gmra.mxu3 %vm923_vm1, %v878_v12 }
  0xd9   : > { %v936_v27 = vpop.f32.mrf.mxu0  ;;  %v961_v28 = vpop.f32.mrf.mxu1 }
  0xda   : > { %v962_v49 = vadd.f32 %v2309_v41, %v961_v28  ;;  %v937_v52 = vadd.f32 %v2308_v44, %v936_v27 }
  0xdc   : > { %v1280_v57 = vpack.c.bf16 %v962_v49, %v962_v49  ;;  %v1279_v62 = vpack.c.bf16 %v937_v52, %v937_v52 }
  0xe0   : > { %v986_v29 = vpop.f32.mrf.mxu2  ;;  %v1011_v30 = vpop.f32.mrf.mxu3 }
  0xe1   : > { %v938_v31 = vpop.f32.mrf.mxu0  ;;  %v963_v32 = vpop.f32.mrf.mxu1  ;;  %v987_v1 = vadd.f32 %v2310_v58, %v986_v29  ;;  %v1012_v2 = vadd.f32 %v2311_v59, %v1011_v30 }
  0xe2   : > { %v1287_v32 = vld [vmem:[%s2986_s12] sm:$0xff] }
  0xe3   : > { %v1281_v5 = vpack.c.bf16 %v987_v1, %v987_v1  ;;  %v1282_v6 = vpack.c.bf16 %v1012_v2, %v1012_v2 }
  0xe8   : > { %v988_v35 = vpop.f32.mrf.mxu2  ;;  %v1013_v36 = vpop.f32.mrf.mxu3 }
  0xe9   : > { %v1068_v37 = vpop.f32.mrf.mxu0  ;;  %v1093_v38 = vpop.f32.mrf.mxu1 }
  0xea   : > { %v1069_v39 = vadd.f32 %v2312_v33, %v1068_v37  ;;  %v1094_v40 = vadd.f32 %v2313_v34, %v1093_v38 }
  0xec   : > { %v1283_v42 = vpack.c.bf16 %v1069_v39, %v1069_v39  ;;  %v1284_v43 = vpack.c.bf16 %v1094_v40, %v1094_v40 }
  0xee   : > { %v1293_v47 = vsel %vm1288_vm2, %v1283_v42, 0  ;;  %v1312_v48 = vsel %vm1288_vm2, %v1284_v43, 0 }
  0xef   : > { %1302 = vmatpush.bf16.xpose.msrb.mxu0 %v1293_v47  ;;  %1321 = vmatpush.bf16.xpose.msrb.mxu1 %v1312_v48 }
  0xf0   : > { %v1118_v50 = vpop.f32.mrf.mxu2  ;;  %v1143_v51 = vpop.f32.mrf.mxu3 }
  0xf1   : > { %v1119_v53 = vadd.f32 %v2314_v45, %v1118_v50  ;;  %v1144_v54 = vadd.f32 %v2315_v46, %v1143_v51  ;;  %v1070_v55 = vpop.f32.mrf.mxu0  ;;  %v1095_v56 = vpop.f32.mrf.mxu1 }
  0xf3   : > { %v1285_v60 = vpack.c.bf16 %v1119_v53, %v1119_v53  ;;  %v1286_v61 = vpack.c.bf16 %v1144_v54, %v1144_v54 }
  0xf5   : > { %v1331_v63 = vsel %vm1288_vm2, %v1285_v60, 0  ;;  %v1350_v0 = vsel %vm1288_vm2, %v1286_v61, 0 }
  0xf6   : > { %1340 = vmatpush.bf16.xpose.msrb.mxu2 %v1331_v63  ;;  %1359 = vmatpush.bf16.xpose.msrb.mxu3 %v1350_v0 }
  0xf7   : > { %2158 = vmatmul.msk.bf16.vlgmr.msrb.gmra.mxu0 %vm1288_vm2, %v1279_v62  ;;  %2159 = vmatmul.msk.bf16.vlgmr.msrb.gmra.mxu1 %vm1288_vm2, %v1280_v57 }
  0xf8   : > { %v1120_v3 = vpop.f32.mrf.mxu2  ;;  %v1145_v4 = vpop.f32.mrf.mxu3 }
  0xf9   : > { %v1200_v10 = vpop.f32.mrf.mxu0  ;;  %v1225_v11 = vpop.f32.mrf.mxu1 }
  0xfa   : > { %v1201_v12 = vadd.f32 %v2316_v8, %v1200_v10  ;;  %v1226_v13 = vadd.f32 %v2317_v9, %v1225_v11 }
  0xfc   : > { %v1413_v15 = vpack.c.bf16 %v1201_v12, %v1201_v12  ;;  %v1414_v16 = vpack.c.bf16 %v1226_v13, %v1226_v13 }
  0xfd   : > { %2160 = vmatmul.msk.bf16.vlgmr.msrb.gmra.mxu2 %vm1288_vm2, %v1281_v5  ;;  %2161 = vmatmul.msk.bf16.vlgmr.msrb.gmra.mxu3 %vm1288_vm2, %v1282_v6 }
  0xfe   : > { %v1422_v18 = vsel %vm1420_vm3, %v1413_v15, 0  ;;  %v1441_v19 = vsel %vm1420_vm3, %v1414_v16, 0 }
  0xff   : > { %1431 = vmatpush.bf16.msra.mxu0 %v1422_v18  ;;  %1450 = vmatpush.bf16.msra.mxu1 %v1441_v19 }
 0x100   : > { %v1250_v17 = vpop.f32.mrf.mxu2  ;;  %v1275_v26 = vpop.f32.mrf.mxu3 }
 0x101   : > { %v1251_v20 = vadd.f32 %v2318_v14, %v1250_v17  ;;  %v1202_v22 = vpop.f32.mrf.mxu0  ;;  %v1227_v23 = vpop.f32.mrf.mxu1  ;;  %v1276_v28 = vadd.f32 %v2319_v25, %v1275_v26  ;;  %v1500_v26 = vld [vmem:[%s2669_s26 + $0x8] sm:$0xf] }
 0x102   : > { %v1498_v22 = vld [vmem:[%s2669_s26] sm:$0xf] }
 0x103   : > { %v1415_v21 = vpack.c.bf16 %v1251_v20, %v1251_v20  ;;  %v1416_v29 = vpack.c.bf16 %v1276_v28, %v1276_v28  ;;  %v1506_v23 = vsel %vm1420_vm3, %v1498_v22, 0  ;;  %v1501_v28 = vld [vmem:[%s2669_s26 + $0xc] sm:$0xf] }
 0x104   : > { %1515 = vmatpush.bf16.msrb.mxu0 %v1506_v23 }
 0x105   : > { %v1460_v24 = vsel %vm1420_vm3, %v1415_v21, 0  ;;  %v1479_v30 = vsel %vm1420_vm3, %v1416_v29, 0  ;;  %v1563_v29 = vsel %vm1420_vm3, %v1501_v28, 0 }
 0x106   : > { %1469 = vmatpush.bf16.msra.mxu2 %v1460_v24  ;;  %1488 = vmatpush.bf16.msra.mxu3 %v1479_v30  ;;  %v1499_v24 = vld [vmem:[%s2669_s26 + $0x4] sm:$0xf]  ;;  %s2989_s26 = scalar_lea.vmem %s2988_s21, %s2619_s27 }
 0x107   : > { %v1525_v25 = vsel %vm1420_vm3, %v1499_v24, 0  ;;  %v2321_v22 = vld [vmem:[%s2989_s26] ss:$0 sm:$0xff] }
 0x108   : > { %v1252_v27 = vpop.f32.mrf.mxu2  ;;  %v1277_v31 = vpop.f32.mrf.mxu3  ;;  %1534 = vmatpush.bf16.msrb.mxu1 %v1525_v25  ;;  %v2322_v24 = vld [vmem:[%s2991_s24] ss:$0 sm:$0xff] }
 0x109   : > { %v1544_v27 = vsel %vm1420_vm3, %v1500_v26, 0 }
 0x10a   : > { %1553 = vmatpush.bf16.msrb.mxu2 %v1544_v27  ;;  %1572 = vmatpush.bf16.msrb.mxu3 %v1563_v29  ;;  %v2233_v29 = vld [vmem:[%s2692_s8 + $0x8] sm:$0xff] }
 0x174   : > { %v1304_v33 = vpop.f32.mrf.mxu0  ;;  %v1323_v34 = vpop.f32.mrf.mxu1 }
 0x175   : > { %v1305_v35 = vadd.f32 %v1304_v33, %v1287_v32  ;;  %v1324_v37 = vadd.f32 %v1323_v34, %v1287_v32 }
 0x177   : > { %v1365_v36 = vsel %vm1288_vm2, %v1305_v35, -inf  ;;  %v1368_v40 = vsel %vm1288_vm2, %v1324_v37, -inf }
 0x178   : > { %1366 = vmax.xlane.f32.xlu1 %v1365_v36 }
 0x17c   : > { %v1306_v38 = vpop.f32.mrf.mxu0  ;;  %v1325_v39 = vpop.f32.mrf.mxu1 }
 0x180   : > { %v1342_v41 = vpop.f32.mrf.mxu2  ;;  %v1361_v42 = vpop.f32.mrf.mxu3  ;;  %1369 = vmax.xlane.f32.xlu1 %v1368_v40 }
 0x181   : > { %v1343_v43 = vadd.f32 %v1342_v41, %v1287_v32  ;;  %v1362_v45 = vadd.f32 %v1361_v42, %v1287_v32 }
 0x183   : > { %v1371_v44 = vsel %vm1288_vm2, %v1343_v43, -inf  ;;  %v1374_v48 = vsel %vm1288_vm2, %v1362_v45, -inf }
 0x184   : > { %1372 = vmax.xlane.f32.xlu0 %v1371_v44 }
 0x188   : > { %v1344_v46 = vpop.f32.mrf.mxu2  ;;  %v1363_v47 = vpop.f32.mrf.mxu3 }
 0x18c   : > { %1375 = vmax.xlane.f32.xlu0 %v1374_v48 }
 0x1eb   : > { %v1367_v49 = vpop.xlane.xlu1 %1366 }
 0x1ec   : > { %v1377_v50 = vsub.f32 %v1305_v35, %v1367_v49 }
 0x1ee   : > { %v1381_v51 = vmul.f32 1.442695, %v1377_v50 }
 0x1f0   : > { %2327 = vpow2.f32 %v1381_v51 }
 0x1f3   : > { %v1370_v52 = vpop.xlane.xlu1 %1369 }
 0x1f4   : > { %v1378_v53 = vsub.f32 %v1324_v37, %v1370_v52 }
 0x1f6   : > { %v2328_v54 = vpop.eup %2327  ;;  %v1383_v55 = vmul.f32 1.442695, %v1378_v53 }
 0x1f7   : > { %v1373_v56 = vpop.xlane.xlu0 %1372  ;;  %v1389_v57 = vsel %vm1288_vm2, %v2328_v54, 0.0 }
 0x1f8   : > { %2329 = vpow2.f32 %v1383_v55  ;;  %v1379_v58 = vsub.f32 %v1343_v43, %v1373_v56  ;;  %1390 = vadd.xlane.f32.xlu0 %v1389_v57 }
 0x1fa   : > { %v1385_v59 = vmul.f32 1.442695, %v1379_v58 }
 0x1fc   : > { %2331 = vpow2.f32 %v1385_v59 }
 0x1fe   : > { %v2330_v60 = vpop.eup %2329 }
 0x1ff   : > { %v1376_v61 = vpop.xlane.xlu0 %1375  ;;  %v1392_v62 = vsel %vm1288_vm2, %v2330_v60, 0.0 }
 0x200   : > { %v1380_v63 = vsub.f32 %v1362_v45, %v1376_v61  ;;  %1393 = vadd.xlane.f32.xlu1 %v1392_v62  ;;  %v2445_v61 = vmov 32.0  }
 0x202   : > { %v2332_v0 = vpop.eup %2331  ;;  %v1387_v1 = vmul.f32 1.442695, %v1380_v63 }
 0x203   : > { %v1395_v2 = vsel %vm1288_vm2, %v2332_v0, 0.0 }
 0x204   : > { %2333 = vpow2.f32 %v1387_v1  ;;  %1396 = vadd.xlane.f32.xlu2 %v1395_v2 }
 0x20a   : > { %v2334_v3 = vpop.eup %2333 }
 0x20b   : > { %v1398_v4 = vsel %vm1288_vm2, %v2334_v3, 0.0 }
 0x20c   : > { %1399 = vadd.xlane.f32.xlu2 %v1398_v4 }
 0x26b   : > { %v1391_v5 = vpop.xlane.xlu0 %1390 }
 0x26c   : > { %2335 = vrcp.f32 %v1391_v5 }
 0x272   : > { %v2336_v6 = vpop.eup %2335 }
 0x273   : > { %v1405_v8 = vmul.f32 %v2336_v6, %v2328_v54  ;;  %v1394_v9 = vpop.xlane.xlu1 %1393  ;;  %v2320_v54 = vld [vmem:[%s2987_s2] ss:$0 sm:$0xff] }
 0x274   : > { %2337 = vrcp.f32 %v1394_v9  ;;  %v2231_v9 = vld [vmem:[%s2682_s6 + $0x8] sm:$0xff] }
 0x275   : > { %v1409_v10 = vpack.c.bf16 %v1405_v8, %v1405_v8 }
 0x277   : > { %v1397_v11 = vpop.xlane.xlu2 %1396  ;;  %2162 = vmatmul.msk.bf16.vlgmr.msra.gmra.mxu0 %vm1288_vm2, %v1409_v10  ;;  %v2230_v10 = vld [vmem:[%s2682_s6] sm:$0xff] }
 0x278   : > { %2339 = vrcp.f32 %v1397_v11  ;;  %1660 = vmatpush.bf16.msra.mxu0 %v2231_v9  ;;  %v2235_v11 = vld [vmem:[%s2692_s8 + $0x18] sm:$0xff] }
 0x27a   : > { %v2338_v12 = vpop.eup %2337 }
 0x27b   : > { %v1406_v13 = vmul.f32 %v2338_v12, %v2330_v60 }
 0x27c   : > { %1661 = vmatpush.bf16.msra.mxu0 %v2230_v10 }
 0x27d   : > { %v1410_v14 = vpack.c.bf16 %v1406_v13, %v1406_v13 }
 0x27e   : > { %v2340_v15 = vpop.eup %2339 }
 0x27f   : > { %v1407_v16 = vmul.f32 %v2340_v15, %v2332_v0  ;;  %v1400_v17 = vpop.xlane.xlu2 %1399  ;;  %2163 = vmatmul.msk.bf16.vlgmr.msra.gmra.mxu1 %vm1288_vm2, %v1410_v14  ;;  %v2234_v14 = vld [vmem:[%s2692_s8 + $0x10] sm:$0xff] }
 0x280   : > { %2341 = vrcp.f32 %v1400_v17  ;;  %1713 = vmatpush.bf16.msra.mxu1 %v2235_v11 }
 0x281   : > { %v1411_v18 = vpack.c.bf16 %v1407_v16, %v1407_v16  ;;  %2343 = vrcp.f32 %v2445_v61 }
 0x283   : > { %2164 = vmatmul.msk.bf16.vlgmr.msra.gmra.mxu2 %vm1288_vm2, %v1411_v18 }
 0x284   : > { %1714 = vmatpush.bf16.msra.mxu1 %v2234_v14 }
 0x286   : > { %v2342_v19 = vpop.eup %2341 }
 0x287   : > { %v1408_v20 = vmul.f32 %v2342_v19, %v2334_v3  ;;  %v2344_v62 = vpop.eup %2343 }
 0x288   : > { %v1595_v63 = vmul.f32 32.0, %v2344_v62  ;;  %vm1599_vm4 = vweird.f32 %v2344_v62  ;;  %1715 = vmatpush.bf16.msra.mxu1 %v2233_v29 }
 0x289   : > { %v1412_v21 = vpack.c.bf16 %v1408_v20, %v1408_v20 }
 0x28a   : > { %v1596_v0 = vsub.f32 1.0, %v1595_v63 }
 0x28b   : > { %2165 = vmatmul.msk.bf16.vlgmr.msra.gmra.mxu3 %vm1288_vm2, %v1412_v21 }
 0x28c   : > { %v1597_v1 = vmul.f32 %v2344_v62, %v1596_v0 }
 0x28e   : > { %v1598_v2 = vadd.f32 %v2344_v62, %v1597_v1 }
 0x290   : > { %v1600_v3 = vsel %vm1599_vm4, %v2344_v62, %v1598_v2 }
 0x2f4   : > { %v1433_v30 = vpop.f32.mrf.mxu0 }
 0x2f5   : > { %v1494_v31 = vpack.c.bf16 %v1433_v30, %v1433_v30  ;;  %v2232_v30 = vld [vmem:[%s2692_s8] sm:$0xff]  ;;  %s2993_s8 = sld [smem:[#allocation10_spill]] }
 0x2f6   : > { %1716 = vmatpush.bf16.msra.mxu1 %v2232_v30 }
 0x2f7   : > { %2166 = vmatmul.msk.bf16.vlgmr.msrb.gmra.mxu0 %vm1288_vm2, %v1494_v31  ;;  %v2323_v31 = vld [vmem:[%s854_s22] ss:$0 sm:$0xff] }
 0x2fb   : > { %s2197_s22 = sshll.u32 %s2993_s8, 3 }
 0x2fc   : > { %v1435_v32 = vpop.f32.mrf.mxu0  ;;  %v1452_v33 = vpop.f32.mrf.mxu1  ;;  %s1768_s2 = scalar_lea.hbm %s2996_s16, %s2197_s22 }
 0x2fd   : > { %v1495_v34 = vpack.c.bf16 %v1452_v33, %v1452_v33  ;;  %s1772_s15 = sshll.u32 %s1768_s2, 4  ;;  %s1773_s15 = int_to_ptr.hbm [resolvable:$true] %s1772_s15 }
 0x2fe   : > { %s2363_s24 = sshra.s32 %s1773_s15, 4  ;;  %s2364_s24 = int_to_ptr.hbm [resolvable:$true] %s2363_s24 }
 0x2ff   : > { %2167 = vmatmul.msk.bf16.vlgmr.msrb.gmra.mxu1 %vm1288_vm2, %v1495_v34  ;;  %s2365_s5 = scalar_lea.hbm %s2364_s24, 8  ;;  %p2370_p5 = scmp.lt.s32.totalorder %s2364_s24, %s2996_s16 }
 0x300   : > { %p2366_p1 = scmp.ne.s32.totalorder %s2364_s24, %s2365_s5  ;;  %p2371_p6 = scmp.lt.s32.totalorder %s2369_s30, %s2365_s5 }
 0x302   : > { %p2367_p2 = pnand %p2366_p1, %p2590_p3  ;;  %p2372_p7 = por %p2371_p6, %p2370_p5 }
 0x304   : > { %v1454_v35 = vpop.f32.mrf.mxu1  ;;  %p2368_p4 = pneg %p2367_p2 }
 0x306   : > { %v1471_v36 = vpop.f32.mrf.mxu2  ;;  %p2373_p8 = pnand %p2372_p7, %p2368_p4 }
 0x307   : > { %v1496_v37 = vpack.c.bf16 %v1471_v36, %v1471_v36 }
 0x309   : > { %2168 = vmatmul.msk.bf16.vlgmr.msrb.gmra.mxu2 %vm1288_vm2, %v1496_v37  ;;  %v2324_v37 = vld [vmem:[%s862_s17] ss:$0 sm:$0xff]  ;;  %s2994_s17 = sld [smem:[#allocation7_spill]] }
 0x30e   : > { %v1473_v38 = vpop.f32.mrf.mxu2  ;;  %v1490_v39 = vpop.f32.mrf.mxu3 }
 0x30f   : > { %v1497_v40 = vpack.c.bf16 %v1490_v39, %v1490_v39 }
 0x311   : > { %2169 = vmatmul.msk.bf16.vlgmr.msrb.gmra.mxu3 %vm1288_vm2, %v1497_v40 }
 0x316   : > { %v1492_v41 = vpop.f32.mrf.mxu3 }
 0x374   : > { %v1517_v42 = vpop.f32.mrf.mxu0 }
 0x375   : > { %v1578_v48 = vsel %vm923_vm1, %v1517_v42, 0.0 }
 0x37c   : > { %v1519_v43 = vpop.f32.mrf.mxu0  ;;  %v1536_v44 = vpop.f32.mrf.mxu1 }
 0x37d   : > { %v1579_v47 = vsel %vm923_vm1, %v1536_v44, 0.0 }
 0x37e   : > { %v1580_v50 = vadd.f32 %v1579_v47, %v1578_v48 }
 0x384   : > { %v1538_v45 = vpop.f32.mrf.mxu1 }
 0x38c   : > { %v1555_v46 = vpop.f32.mrf.mxu2 }
 0x38d   : > { %v1581_v49 = vsel %vm923_vm1, %v1555_v46, 0.0 }
 0x38e   : > { %v1582_v51 = vadd.f32 %v1581_v49, %v1580_v50 }
 0x394   : > { %v1557_v52 = vpop.f32.mrf.mxu2  ;;  %v1574_v53 = vpop.f32.mrf.mxu3 }
 0x395   : > { %v1583_v55 = vsel %vm923_vm1, %v1574_v53, 0.0 }
 0x396   : > { %v1584_v56 = vadd.f32 %v1583_v55, %v1582_v51 }
 0x398   : > { %v1589_v57 = vadd.f32 %v2320_v54, %v1584_v56 }
 0x39a   : > { %v1590_v58 = vadd.f32 %v1589_v57, %v2714_v7  ;;  %v2325_v57 = vld [vmem:[%s865_s28] ss:$0 sm:$0xff]  ;;  %s2999_s28 = sand.u32 1, %s2994_s17  }
 0x39b   : > { %s1758_s1 = scalar_lea.sflag [#allocation4], %s2999_s28 }
 0x39c   : > { %v1576_v59 = vpop.f32.mrf.mxu3  ;;  %v1591_v60 = vsel %vm923_vm1, %v1590_v58, 0.0 }
 0x39d   : > { %1592 = vadd.xlane.f32.xlu2 %v1591_v60  ;;  %v2326_v60 = vld [vmem:[%s868_s10] ss:$0 sm:$0xff] }
 0x410   : > { %v1593_v4 = vpop.xlane.xlu2 %1592 }
 0x411   : > { %v1601_v5 = vmul.f32 %v1600_v3, %v1593_v4 }
 0x413   : > { %v1602_v7 = vsub.f32 %v1590_v58, %v1601_v5 }
 0x415   : > { %v1603_v6 = vmul.f32 %v1602_v7, %v1602_v7 }
 0x417   : > { %v1604_v8 = vsel %vm923_vm1, %v1603_v6, 0.0 }
 0x418   : > { %1605 = vadd.xlane.f32.xlu0 %v1604_v8 }
 0x48b   : > { %v1606_v12 = vpop.xlane.xlu0 %1605 }
 0x48c   : > { %v1607_v13 = vmul.f32 %v1606_v12, %v1600_v3 }
 0x48e   : > { %v1608_v15 = vadd.f32 1e-05, %v1607_v13 }
 0x490   : > { %2345 = vrsqrt.f32 %v1608_v15  ;;  %vm1615_vm6 = vweird.f32 %v1608_v15 }
 0x496   : > { %v2346_v16 = vpop.eup %2345 }
 0x497   : > { %v1610_v17 = vmul.f32 %v2346_v16, %v1608_v15  ;;  %vm1616_vm5 = vweird.f32 %v2346_v16 }
 0x498   : > { %vm1617_vm7 = vmor %vm1615_vm6, %vm1616_vm5 }
 0x499   : > { %v1611_v18 = vmul.f32 %v2346_v16, %v1610_v17 }
 0x49b   : > { %v1612_v19 = vmul.f32 0.5, %v1611_v18 }
 0x49d   : > { %v1613_v20 = vsub.f32 1.5, %v1612_v19 }
 0x49f   : > { %v1614_v21 = vmul.f32 %v2346_v16, %v1613_v20 }
 0x4a1   : > { %v1618_v23 = vsel %vm1617_vm7, %v2346_v16, %v1614_v21 }
 0x4a2   : > { %v1619_v25 = vmul.f32 %v1618_v23, %v1602_v7 }
 0x4a4   : > { %v1624_v26 = vmul.f32 %v2321_v22, %v1619_v25 }
 0x4a6   : > { %v1629_v27 = vadd.f32 %v2322_v24, %v1624_v26 }
 0x4a8   : > { %v1630_v28 = vpack.c.bf16 %v1629_v27, %v1629_v27 }
 0x4aa   : > { %2178 = vmatmul.msk.bf16.vlgmr.msra.gmra.mxu0 %vm923_vm1, %v1630_v28 }
 0x527   : > { %v1663_v32 = vpop.f32.mrf.mxu0 }
 0x528   : > { %v1664_v33 = vadd.f32 %v2323_v31, %v1663_v32 }
 0x52a   : > { %v1667_v34 = vmax.f32 %v1664_v33, 0.0 }
 0x52c   : > { %v1668_v35 = vpack.c.bf16 %v1667_v34, %v1667_v34 }
 0x52e   : > { %2195 = vmatmul.msk.bf16.vlgmr.msra.gmra.mxu1 %vm1705_vm8, %v1668_v35 }
 0x52f   : > { %v1665_v36 = vpop.f32.mrf.mxu0 }
 0x5ab   : > { %v1718_v38 = vpop.f32.mrf.mxu1 }
 0x5ac   : > { %v1719_v39 = vadd.f32 %v2324_v37, %v1718_v38 }
 0x5ae   : > { %v1722_v40 = vadd.f32 %v1719_v39, %v1629_v27 }
 0x5b0   : > { %v1723_v41 = vsel %vm923_vm1, %v1722_v40, 0.0 }
 0x5b1   : > { %1724 = vadd.xlane.f32.xlu1 %v1723_v41 }
 0x5b3   : > { %v1720_v42 = vpop.f32.mrf.mxu1 }
 0x624   : > { %v1725_v43 = vpop.xlane.xlu1 %1724 }
 0x625   : > { %v1726_v44 = vmul.f32 %v1725_v43, %v1600_v3 }
 0x627   : > { %v1727_v45 = vsub.f32 %v1722_v40, %v1726_v44 }
 0x629   : > { %v1728_v46 = vmul.f32 %v1727_v45, %v1727_v45 }
 0x62b   : > { %v1729_v47 = vsel %vm923_vm1, %v1728_v46, 0.0 }
 0x62c   : > { %1730 = vadd.xlane.f32.xlu2 %v1729_v47 }
 0x69f   : > { %v1731_v48 = vpop.xlane.xlu2 %1730 }
 0x6a0   : > { %v1732_v49 = vmul.f32 %v1731_v48, %v1600_v3 }
 0x6a2   : > { %v1733_v50 = vadd.f32 1e-05, %v1732_v49 }
 0x6a4   : > { %2347 = vrsqrt.f32 %v1733_v50  ;;  %vm1740_vm10 = vweird.f32 %v1733_v50 }
 0x6aa   : > { %v2348_v51 = vpop.eup %2347 }
 0x6ab   : > { %v1735_v52 = vmul.f32 %v2348_v51, %v1733_v50  ;;  %vm1741_vm9 = vweird.f32 %v2348_v51 }
 0x6ac   : > { %vm1742_vm11 = vmor %vm1740_vm10, %vm1741_vm9 }
 0x6ad   : > { %v1736_v53 = vmul.f32 %v2348_v51, %v1735_v52 }
 0x6af   : > { %v1737_v54 = vmul.f32 0.5, %v1736_v53 }
 0x6b1   : > { %v1738_v55 = vsub.f32 1.5, %v1737_v54 }
 0x6b3   : > { %v1739_v56 = vmul.f32 %v2348_v51, %v1738_v55 }
 0x6b5   : > { %v1743_v58 = vsel %vm1742_vm11, %v2348_v51, %v1739_v56 }
 0x6b6   : > { %v1744_v59 = vmul.f32 %v1743_v58, %v1727_v45 }
 0x6b8   : > { %v1749_v61 = vmul.f32 %v2325_v57, %v1744_v59 }
 0x6ba   : > { %v1754_v62 = vadd.f32 %v2326_v60, %v1749_v61 }
 0x6bc   : > { %1755 = vst.msk [vmem:[#allocation2] sm:$0xff] %vm923_vm1, %v1754_v62 }
 0x6bd   : > { %1756 = vst.msk [vmem:[%s797_s4] sm:$0xff] %vm923_vm1, %v1754_v62 }
 0x6be   : > { %2376 = shalt.err (!%p2373_p8)
}
 0x6bf   : > { %2236 = dma.vmem_to_hbm [thread:$0]  (%p2590_p3), %s1771_s18, 128, %s1773_s15, %s1758_s1  }
 0x6c0 PF: > { %s3000_s19 = sld [smem:[#allocation13_spill]] }
 0x6c1   : > { %s3001_s4 = sld [smem:[#allocation6_spill]] }
 0x6c6   : > { %p2242_p10 = scmp.ge.s32.totalorder %s3000_s19, 2 }
 0x6c7   : > { %s1784_s8 = sand.u32 1, %s3001_s4  }
 0x6c8   : > { %p2239_p11 = pnand %p2242_p10, %p2600_p9  ;;  %s1785_s22 = scalar_lea.sflag [#allocation4], %s1784_s8 }
 0x6ca   : > { %p2240_p12 = pneg %p2239_p11 }
 0x6cc   : > { %2410 = dma.done.wait (%p2240_p12), %s1785_s22, 128  }
 0x6cd   : > { %2412 = vsyncadd (%p2240_p12), %s1785_s22, 4294967168  ;;  %s31_s20 = sadd.s32 1, %s3000_s19   ;;  %s3003_s27 = sld [smem:[#allocation7_spill]] }
 0x6ce   : > { %p28_p13 = scmp.ge.s32.totalorder %s31_s20, 6   ;;  %s3004_s28 = sld [smem:[#allocation8_spill]] }
 0x6cf   : > { %s3005_s29 = sld [smem:[#allocation18_spill]] }
 0x6d0   : > { %s3006_s30 = sld [smem:[#allocation11_spill]]  ;;  %30 = sbr.rel (!%p28_p13) target bundleno = 22 (0x16), region = 182 }
 0x6d1   : > { %s3007_s0 = sld [smem:[#allocation12_spill]] }
 0x6d2   : > { %s3008_s19 = sld [smem:[#allocation14_spill]] }
 0x6d3   : > { %s3009_s1 = sld [smem:[#allocation16_spill]] }
 0x6d5   :  { %1791 = vsyncpa [#allocation4], 1 }
 0x6d6   :  { %1793 = vsyncpa [#allocation4 + $0x1], 1 }

</bundles_post_ra>
